<compile_context>
chip_gen: v5e
topology: v5e:2x2
jax: 0.10.0
libtpu: 0.0.40
codegen_flags: <defaults>
</compile_context>

<pallas_src>
import functools
import math

import jax
import jax.numpy as jnp
import numpy as np
from jax import lax
from jax.experimental import pallas as pl
from jax.experimental.pallas import tpu as pltpu


# -----------------------------------------------------------------------------
# Tiling helpers
# -----------------------------------------------------------------------------
def _largest_aligned_divisor(n, cap, align):
    """Largest divisor of n that is <= cap and a multiple of `align`
    (falls back to n itself, i.e. a full-extent block)."""
    cap = min(cap, n)
    for t in range(cap, 0, -1):
        if n % t == 0 and (t % align == 0 or t == n):
            return t
    return n


def _heads_per_group(num_heads, head_size):
    """Group heads so each group spans a lane-aligned slab (128 lanes when
    possible) -> no misaligned 64-wide slices for Dh=64 configs."""
    if head_size >= 128 or 128 % head_size != 0:
        return 1
    hpg = 128 // head_size
    while hpg > 1 and num_heads % hpg != 0:
        hpg //= 2
    return hpg


# -----------------------------------------------------------------------------
# Kernel 1: fused Q|K|V projection (single matmul, weight-stationary)
#   y = x @ W_cat + b_cat,  W_cat = [Wq*scale | Wk | Wv] with LoRA folded in.
#   Output is (3, M, H) so the attention kernel can index q/k/v as blocks.
# -----------------------------------------------------------------------------
def _qkv_proj_kernel(x_ref, w_ref, b_ref, o_ref, *, hidden):
    x = x_ref[...]                                                   # [tm, H]
    y = jnp.dot(x, w_ref[...], preferred_element_type=jnp.float32)   # [tm, 3H] f32
    y = (y + b_ref[...]).astype(o_ref.dtype)
    o_ref[0] = y[:, :hidden]                 # q (scale already folded in)
    o_ref[1] = y[:, hidden:2 * hidden]       # k
    o_ref[2] = y[:, 2 * hidden:]             # v


def fused_qkv_projection(x2d, w_cat, b_cat, *, out_dtype, tile_m=None,
                         vmem_limit_bytes=None):
    """x2d: [M, H] (compute dtype).  w_cat: [H, 3H] pre-transposed with LoRA
    and query scaling folded.  b_cat: [1, 3H] f32.  Returns qkv: [3, M, H]."""
    M, H = x2d.shape
    is_bf16 = x2d.dtype == jnp.bfloat16
    align = 16 if is_bf16 else 8
    cap = 512 if is_bf16 else 256            # v5e-safe cap for the f32 path
    tm = tile_m if tile_m is not None else _largest_aligned_divisor(M, cap, align)

    # The weight block index is constant across the grid: double-buffering it
    # only wastes VMEM, so single-buffer when it is large (v7x / v5e budgets).
    w_kwargs = ({"pipeline_mode": pl.Buffered(1)}
                if w_cat.size * w_cat.dtype.itemsize >= (8 << 20) else {})

    cp = dict(dimension_semantics=("parallel",))
    if vmem_limit_bytes is not None:
        cp["vmem_limit_bytes"] = vmem_limit_bytes

    return pl.pallas_call(
        functools.partial(_qkv_proj_kernel, hidden=H),
        out_shape=jax.ShapeDtypeStruct((3, M, H), out_dtype),
        grid=(M // tm,),
        in_specs=[
            pl.BlockSpec((tm, H), lambda i: (i, 0)),
            pl.BlockSpec((H, 3 * H), lambda i: (0, 0), **w_kwargs),
            pl.BlockSpec((1, 3 * H), lambda i: (0, 0)),
        ],
        out_specs=pl.BlockSpec((3, tm, H), lambda i: (0, i, 0)),
        compiler_params=pltpu.CompilerParams(**cp),
    )(x2d, w_cat, b_cat)


# -----------------------------------------------------------------------------
# Kernel 2: dense softmax attention, q-tiled, [B, T, H] layout throughout.
#   grid = (B, T // tq); K/V block index is constant across the q-tile axis.
# -----------------------------------------------------------------------------
def _attn_kernel(q_ref, k_ref, v_ref, m_ref, o_ref, *maybe_p_ref,
                 head_size, heads_per_group, num_groups, write_probs, use_fori):
    p_ref = maybe_p_ref[0] if write_probs else None
    mask = m_ref[...]                          # [1, T] additive mask, f32
    gw = heads_per_group * head_size           # lane width of one head group

    def one_head(q_h, k_h, v_h, h_idx):
        # q_h @ k_h^T: contract last dims, no transpose materialized.
        # 1/sqrt(Dh) is already folded into the query projection weights.
        s = lax.dot_general(q_h, k_h, (((1,), (1,)), ((), ())),
                            preferred_element_type=jnp.float32)      # [tq, T]
        s = s + mask
        s = s - jnp.max(s, axis=-1, keepdims=True)
        e = jnp.exp(s)
        denom = jnp.sum(e, axis=-1, keepdims=True)                   # [tq, 1]
        # EUP approximate reciprocal + 2 Newton steps (on [tq, 1] -> ~free,
        # recovers full f32 accuracy for the exact-tolerance path).
        r = pl.reciprocal(denom, approx=True)
        r = r * (2.0 - denom * r)
        r = r * (2.0 - denom * r)
        if write_probs:
            p = e * r
            p_ref[h_idx] = p
            return jnp.dot(p.astype(v_h.dtype), v_h,
                           preferred_element_type=jnp.float32)
        # Flash-style deferred normalization: scale the [tq, Dh] context
        # instead of the [tq, T] probabilities.
        ctx_un = jnp.dot(e.astype(v_h.dtype), v_h,
                         preferred_element_type=jnp.float32)
        return ctx_un * r

    def process_group(g, lo):
        q_g = q_ref[:, pl.ds(lo, gw)]          # [tq, gw]
        k_g = k_ref[:, pl.ds(lo, gw)]          # [T,  gw]
        v_g = v_ref[:, pl.ds(lo, gw)]          # [T,  gw]
        parts = []
        for j in range(heads_per_group):
            a = j * head_size
            parts.append(one_head(q_g[:, a:a + head_size],
                                  k_g[:, a:a + head_size],
                                  v_g[:, a:a + head_size],
                                  g * heads_per_group + j))
        ctx_g = parts[0] if len(parts) == 1 else jnp.concatenate(parts, axis=-1)
        # Store this group's context now -> live ranges stay one group wide.
        o_ref[:, pl.ds(lo, gw)] = ctx_g.astype(o_ref.dtype)

    if use_fori:
        # Visible loop bounds vreg pressure at real head counts (Nh = 12/16).
        # Only taken when gw % 128 == 0, so dynamic lane offsets stay aligned.
        def body(g, carry):
            process_group(g, pl.multiple_of(g * gw, 128))
            return carry
        lax.fori_loop(0, num_groups, body, 0, unroll=True)
    else:
        for g in range(num_groups):
            process_group(g, g * gw)


def multi_head_attention(qkv, attention_mask, num_heads, head_size, *,
                         return_probs=False, q_tile=None, vmem_limit_bytes=None):
    """qkv: [3, B, T, H] (q/k/v stacked).  attention_mask: [B, 1, 1, T] f32."""
    _, B, T, H = qkv.shape
    is_bf16 = qkv.dtype == jnp.bfloat16
    align = 16 if is_bf16 else 8
    cap = 512 if is_bf16 else 256
    tq = q_tile if q_tile is not None else _largest_aligned_divisor(T, cap, align)

    hpg = _heads_per_group(num_heads, head_size)
    num_groups = num_heads // hpg
    gw = hpg * head_size
    use_fori = (not return_probs) and (gw % 128 == 0) and num_groups > 1

    kernel = functools.partial(
        _attn_kernel, head_size=head_size, heads_per_group=hpg,
        num_groups=num_groups, write_probs=return_probs, use_fori=use_fori)

    # K/V are resident across the q-tile axis (block index changes only with
    # b); single-buffer them when large so long-T configs fit v7x's VMEM.
    kv_kwargs = ({"pipeline_mode": pl.Buffered(1)}
                 if T * H * qkv.dtype.itemsize >= (4 << 20) else {})
    q_spec = pl.BlockSpec((None, None, tq, H), lambda b, qi: (0, b, qi, 0))
    k_spec = pl.BlockSpec((None, None, T, H), lambda b, qi: (1, b, 0, 0), **kv_kwargs)
    v_spec = pl.BlockSpec((None, None, T, H), lambda b, qi: (2, b, 0, 0), **kv_kwargs)
    m_spec = pl.BlockSpec((None, None, 1, T), lambda b, qi: (b, 0, 0, 0))

    if return_probs:
        out_shape = (jax.ShapeDtypeStruct((B, T, H), qkv.dtype),
                     jax.ShapeDtypeStruct((B, num_heads, T, T), jnp.float32))
        out_specs = (pl.BlockSpec((None, tq, H), lambda b, qi: (b, qi, 0)),
                     pl.BlockSpec((None, num_heads, tq, T),
                                  lambda b, qi: (b, 0, qi, 0)))
    else:
        out_shape = jax.ShapeDtypeStruct((B, T, H), qkv.dtype)
        out_specs = pl.BlockSpec((None, tq, H), lambda b, qi: (b, qi, 0))

    cp = dict(dimension_semantics=("parallel", "parallel"))
    if vmem_limit_bytes is not None:
        cp["vmem_limit_bytes"] = vmem_limit_bytes

    result = pl.pallas_call(
        kernel,
        out_shape=out_shape,
        grid=(B, T // tq),
        in_specs=[q_spec, k_spec, v_spec, m_spec],
        out_specs=out_specs,
        compiler_params=pltpu.CompilerParams(**cp),
    )(qkv, qkv, qkv, attention_mask)

    if return_probs:
        return result[0], result[1]
    return result, None


# -----------------------------------------------------------------------------
# Wrapper reproducing PerlinSelfAttention.forward (inference, default config:
# lora_enabled=True, lora_in_approx_enabled=False, causal=False)
# -----------------------------------------------------------------------------
def perlin_self_attention_forward(hidden_states, params, attention_mask,
                                  num_heads, head_size, *,
                                  return_probs=False,
                                  compute_dtype=jnp.bfloat16,
                                  vmem_limit_bytes=None):
    B, T, H = hidden_states.shape
    x2d = hidden_states.reshape(B * T, H).astype(compute_dtype)

    # Parameter prep (exact; in a deployment this fold happens once at load):
    #   * fold LoRA:  x @ W^T + b + s*(x @ A^T) @ B^T == x @ (W + s*B@A)^T + b
    #   * fold 1/sqrt(Dh) into the query weight & bias (drops the in-kernel
    #     `s * scale` VPU multiply)
    #   * pre-transpose to [H_in, H_out] and concatenate q|k|v -> one matmul.
    scale = 1.0 / math.sqrt(head_size)
    w_cols, b_cols = [], []
    for name, s in (("query", scale), ("key", 1.0), ("value", 1.0)):
        p = params[name]
        w_eff = p["W"] + p["lora_scaling"] * jnp.dot(
            p["lora_B"], p["lora_A"], precision=lax.Precision.HIGHEST)
        w_cols.append((s * w_eff).T)
        b_cols.append(s * p["b"])
    w_cat = jnp.concatenate(w_cols, axis=1).astype(compute_dtype)    # [H, 3H]
    b_cat = jnp.concatenate(b_cols).reshape(1, 3 * H).astype(jnp.float32)

    qkv = fused_qkv_projection(x2d, w_cat, b_cat, out_dtype=compute_dtype,
                               vmem_limit_bytes=vmem_limit_bytes)
    qkv = qkv.reshape(3, B, T, H)

    # lora_in_approx_enabled == False  =>  q_for_atten = q_for_score = q, etc.
    return multi_head_attention(qkv, attention_mask.astype(jnp.float32),
                                num_heads, head_size,
                                return_probs=return_probs,
                                vmem_limit_bytes=vmem_limit_bytes)


# -----------------------------------------------------------------------------
# Pure-JAX reference (faithful, un-folded LoRA) for correctness check
# -----------------------------------------------------------------------------
def reference_forward(hidden_states, params, attention_mask, num_heads, head_size):
    B, T, H = hidden_states.shape

    def proj(p):
        y = hidden_states @ p["W"].T + p["b"]
        y = y + p["lora_scaling"] * ((hidden_states @ p["lora_A"].T) @ p["lora_B"].T)
        return y.reshape(B, T, num_heads, head_size).transpose(0, 2, 1, 3)

    q, k, v = proj(params["query"]), proj(params["key"]), proj(params["value"])
    s = jnp.einsum("bhqd,bhkd->bhqk", q, k) / math.sqrt(head_size)
    s = s + attention_mask
    p = jax.nn.softmax(s, axis=-1)
    ctx = jnp.einsum("bhqk,bhkd->bhqd", p, v)
    return ctx.transpose(0, 2, 1, 3).reshape(B, T, H), p


# -----------------------------------------------------------------------------
# Deterministic parameter construction (BertConfig-style shapes)
# -----------------------------------------------------------------------------
def make_params(key, hidden_size, lora_r, lora_alpha=None):
    if lora_alpha is None:
        lora_alpha = lora_r  # scaling = alpha / r = 1.0
    params = {}
    for i, name in enumerate(("query", "key", "value")):
        k0, k1, k2, k3 = jax.random.split(jax.random.fold_in(key, i), 4)
        params[name] = {
            "W": 0.02 * jax.random.normal(k0, (hidden_size, hidden_size), jnp.float32),
            "b": 0.02 * jax.random.normal(k1, (hidden_size,), jnp.float32),
            "lora_A": 0.02 * jax.random.normal(k2, (lora_r, hidden_size), jnp.float32),
            # standard LoRA inits B to zero; use small nonzero values so the
            # LoRA fold is actually exercised.
            "lora_B": 0.02 * jax.random.normal(k3, (hidden_size, lora_r), jnp.float32),
            "lora_scaling": float(lora_alpha) / float(lora_r),
        }
    return params


if __name__ == "__main__":
    # Small BertConfig-like shapes: hidden=32, heads=4 -> head_size=8, lora_r=8.
    B, T, H, NH, R = 2, 16, 32, 4, 8
    DH = H // NH

    key = jax.random.PRNGKey(0)
    k_x, k_p = jax.random.split(key)
    hidden_states = jax.random.normal(k_x, (B, T, H), jnp.float32)
    params = make_params(k_p, H, R)

    # Additive attention mask [B, 1, 1, T]: batch 1 has its last 3 tokens masked.
    mask = np.zeros((B, 1, 1, T), np.float32)
    mask[1, :, :, -3:] = -10000.0
    attention_mask = jnp.asarray(mask)

    ref_ctx, ref_probs = reference_forward(
        hidden_states, params, attention_mask, NH, DH)

    # (1) Default fast path: bf16 MXU compute, flash-style deferred
    #     normalization, probs NOT materialized.
    ctx, probs = perlin_self_attention_forward(
        hidden_states, params, attention_mask, NH, DH)
    ctx = jax.block_until_ready(ctx)
    assert probs is None
    np.testing.assert_allclose(np.asarray(ctx.astype(jnp.float32)),
                               np.asarray(ref_ctx), rtol=2e-2, atol=2e-2)

    # (2) f32 path: exact against the un-folded reference.
    ctx32, _ = perlin_self_attention_forward(
        hidden_states, params, attention_mask, NH, DH,
        compute_dtype=jnp.float32)
    ctx32 = jax.block_until_ready(ctx32)
    np.testing.assert_allclose(np.asarray(ctx32), np.asarray(ref_ctx),
                               rtol=1e-5, atol=1e-5)

    # (3) f32 path with probs (checkout_last_attention_probs-style usage).
    ctx3, probs3 = perlin_self_attention_forward(
        hidden_states, params, attention_mask, NH, DH,
        return_probs=True, compute_dtype=jnp.float32)
    ctx3 = jax.block_until_ready(ctx3)
    np.testing.assert_allclose(np.asarray(ctx3), np.asarray(ref_ctx),
                               rtol=1e-5, atol=1e-5)
    np.testing.assert_allclose(np.asarray(probs3), np.asarray(ref_probs),
                               rtol=1e-5, atol=1e-5)

    print("KERNEL_OK")
</pallas_src>

<mosaic_0001>
module attributes {stable_mosaic.version = 11 : i64} {
  func.func @_qkv_proj_kernel(%arg0: i32, %arg1: memref<32x32xbf16, #tpu.memory_space<vmem>>, %arg2: memref<32x96xbf16, #tpu.memory_space<vmem>>, %arg3: memref<1x96xf32, #tpu.memory_space<vmem>>, %arg4: memref<3x32x32xbf16, #tpu.memory_space<vmem>>) attributes {dimension_semantics = [#tpu.dimension_semantics<parallel>], iteration_bounds = array<i64: 1>, scalar_prefetch = 0 : i64, scratch_operands = 0 : i64, tpu.core_type = #tpu.core_type<tc>, window_params = [{transform_indices = @transform_0, window_bounds = array<i64: 32, 32>}, {pipeline_mode = #tpu.pipeline_mode<synchronous>, transform_indices = @transform_1, window_bounds = array<i64: 32, 96>}, {pipeline_mode = #tpu.pipeline_mode<synchronous>, transform_indices = @transform_2, window_bounds = array<i64: 1, 96>}, {transform_indices = @transform_3, window_bounds = array<i64: 3, 32, 32>}]} {
    %c0 = arith.constant 0 : index
    %c0_0 = arith.constant 0 : index
    %0 = vector.load %arg1[%c0, %c0_0] : memref<32x32xbf16, #tpu.memory_space<vmem>>, vector<32x32xbf16>
    %c0_1 = arith.constant 0 : index
    %c0_2 = arith.constant 0 : index
    %1 = vector.load %arg2[%c0_1, %c0_2] : memref<32x96xbf16, #tpu.memory_space<vmem>>, vector<32x96xbf16>
    %cst = arith.constant dense<0.000000e+00> : vector<32x96xf32>
    %2 = tpu.matmul %0, %1, %cst {dimension_numbers = #tpu.dot_dimension_numbers<[1], [0], [0], [1], [0, 0, 1, 1], [], []>} : vector<32x32xbf16>, vector<32x96xbf16>, vector<32x96xf32> -> vector<32x96xf32>
    %c0_3 = arith.constant 0 : index
    %c0_4 = arith.constant 0 : index
    %3 = vector.load %arg3[%c0_3, %c0_4] : memref<1x96xf32, #tpu.memory_space<vmem>>, vector<1x96xf32>
    %4 = vector.broadcast %3 : vector<1x96xf32> to vector<32x96xf32>
    %5 = arith.addf %2, %4 : vector<32x96xf32>
    %6 = arith.truncf %5 : vector<32x96xf32> to vector<32x96xbf16>
    %7 = vector.extract_strided_slice %6 {offsets = [0, 0], sizes = [32, 32], strides = [1, 1]} : vector<32x96xbf16> to vector<32x32xbf16>
    %c0_5 = arith.constant 0 : index
    %c0_6 = arith.constant 0 : index
    %c0_7 = arith.constant 0 : index
    %8 = vector.load %arg4[%c0_5, %c0_6, %c0_7] : memref<3x32x32xbf16, #tpu.memory_space<vmem>>, vector<1x32x32xbf16>
    %9 = vector.shape_cast %8 : vector<1x32x32xbf16> to vector<32x32xbf16>
    %10 = vector.shape_cast %7 : vector<32x32xbf16> to vector<1x32x32xbf16>
    tpu.vector_store %arg4[%c0_5, %c0_6, %c0_7], %10 {strides = array<i32>} : memref<3x32x32xbf16, #tpu.memory_space<vmem>>, vector<1x32x32xbf16>,
    %11 = vector.extract_strided_slice %6 {offsets = [0, 32], sizes = [32, 32], strides = [1, 1]} : vector<32x96xbf16> to vector<32x32xbf16>
    %c1 = arith.constant 1 : index
    %c0_8 = arith.constant 0 : index
    %c0_9 = arith.constant 0 : index
    %12 = vector.load %arg4[%c1, %c0_8, %c0_9] : memref<3x32x32xbf16, #tpu.memory_space<vmem>>, vector<1x32x32xbf16>
    %13 = vector.shape_cast %12 : vector<1x32x32xbf16> to vector<32x32xbf16>
    %14 = vector.shape_cast %11 : vector<32x32xbf16> to vector<1x32x32xbf16>
    tpu.vector_store %arg4[%c1, %c0_8, %c0_9], %14 {strides = array<i32>} : memref<3x32x32xbf16, #tpu.memory_space<vmem>>, vector<1x32x32xbf16>,
    %15 = vector.extract_strided_slice %6 {offsets = [0, 64], sizes = [32, 32], strides = [1, 1]} : vector<32x96xbf16> to vector<32x32xbf16>
    %c2 = arith.constant 2 : index
    %c0_10 = arith.constant 0 : index
    %c0_11 = arith.constant 0 : index
    %16 = vector.load %arg4[%c2, %c0_10, %c0_11] : memref<3x32x32xbf16, #tpu.memory_space<vmem>>, vector<1x32x32xbf16>
    %17 = vector.shape_cast %16 : vector<1x32x32xbf16> to vector<32x32xbf16>
    %18 = vector.shape_cast %15 : vector<32x32xbf16> to vector<1x32x32xbf16>
    tpu.vector_store %arg4[%c2, %c0_10, %c0_11], %18 {strides = array<i32>} : memref<3x32x32xbf16, #tpu.memory_space<vmem>>, vector<1x32x32xbf16>,
    return
  }
  func.func @transform_0(%arg0: i32) -> (i32, i32) {
    %c0_i32 = arith.constant 0 : i32
    %c0_i32_0 = arith.constant 0 : i32
    return %arg0, %c0_i32 : i32, i32
  }
  func.func @transform_1(%arg0: i32) -> (i32, i32) {
    %c0_i32 = arith.constant 0 : i32
    %c0_i32_0 = arith.constant 0 : i32
    %c0_i32_1 = arith.constant 0 : i32
    return %c0_i32, %c0_i32_0 : i32, i32
  }
  func.func @transform_2(%arg0: i32) -> (i32, i32) {
    %c0_i32 = arith.constant 0 : i32
    %c0_i32_0 = arith.constant 0 : i32
    %c0_i32_1 = arith.constant 0 : i32
    return %c0_i32, %c0_i32_0 : i32, i32
  }
  func.func @transform_3(%arg0: i32) -> (i32, i32, i32) {
    %c0_i32 = arith.constant 0 : i32
    %c0_i32_0 = arith.constant 0 : i32
    %c0_i32_1 = arith.constant 0 : i32
    return %c0_i32, %arg0, %c0_i32_0 : i32, i32, i32
  }
}

</mosaic_0001>

<bundles_post_ra>
// kernel: tpu_custom_call.1
= control target key start
LH: loop header
LB: loop body
LE: loop exit
PB: predicated region body
PF: predicated region fallthrough
CT: control target
= control target key end

     0   :  { %8 = vsyncpa [#allocation3], 0  ;;  %s347_s0 = inlined_call_operand.hbm [shape: bf16[32,32], index: 0, kind: input, shape index: {}]   ;;  %s348_s1 = inlined_call_operand.hbm [shape: bf16[32,96], index: 1, kind: input, shape index: {}]   ;;  %s349_s2 = inlined_call_operand.vmem [shape: f32[1,96], index: 2, kind: input, shape index: {}]   ;;  %s350_s3 = inlined_call_operand.hbm [shape: bf16[3,32,32], index: 3, kind: output, shape index: {}]  }
   0x1   :  { %9 = vsyncpa [#allocation6], 0 }
   0x2   :  { %10 = vsyncpa [#allocation4], 0  ;;  %s15_s14 = sshll.u32 %s347_s0, 4  ;;  %s284_s15 = smov [#allocation2]   ;;  %s16_s14 = int_to_ptr.hbm [resolvable:$true] %s15_s14 }
   0x3   :  { %s17_s16 = sshll.u32 %s284_s15, 4  ;;  %s28_s19 = sshll.u32 %s348_s1, 4  ;;  %s18_s16 = int_to_ptr.vmem [resolvable:$true] %s17_s16  ;;  %s29_s19 = int_to_ptr.hbm [resolvable:$true] %s28_s19 }
   0x4   :  { %s285_s20 = smov 64   ;;  %s286_s21 = smov 4  }
   0x5   :  { %23 = dma.hbm_to_vmem [thread:$0]  %s16_s14, 256, %s18_s16, [#allocation3], %s285_s20, %s285_s20, %s286_s21  }
   0x6   :  { %s287_s22 = smov [#allocation5]  }
   0x7   :  { %s30_s23 = sshll.u32 %s287_s22, 4  ;;  %s31_s23 = int_to_ptr.vmem [resolvable:$true] %s30_s23 }
   0x8   :  { %36 = dma.hbm_to_vmem [thread:$0]  %s29_s19, 256, %s31_s23, [#allocation6], %s285_s20, %s285_s20, %s286_s21  }
   0x9   :  { %278 = dma.done.wait [#allocation3], 256  }
   0xa   :  { %279 = vsyncadd [#allocation3], 4294967040 }
   0xb   :  { %280 = dma.done.wait [#allocation6], 256  }
   0xc   :  { %281 = vsyncadd [#allocation6], 4294967040  ;;  %v196_v0 = vld [vmem:[#allocation5 + $0x8] sm:$0xff]  ;;  %v195_v1 = vld [vmem:[#allocation5] sm:$0xff]  ;;  %vm82_vm0 = vcmask 261120   ;;  %vm112_vm1 = vcmask 257024  }
   0xd   :  { %95 = vmatpush.bf16.msra.mxu0 %v196_v0  ;;  %197 = vmatpush.bf16.msra.mxu1 %v196_v0  ;;  %v193_v2 = vld [vmem:[#allocation2] sm:$0xff]  ;;  %v194_v3 = vld [vmem:[#allocation2 + $0x8] sm:$0xff]  ;;  %s288_s24 = smov 96   ;;  %s161_s28 = sshll.u32 %s350_s3, 4  ;;  %s162_s28 = int_to_ptr.hbm [resolvable:$true] %s161_s28 }
   0xe   :  { %v205_v4 = vld [vmem:[%s349_s2] ss:$0 sm:$0xff]  ;;  %s289_s2 = smov [#allocation7]  }
   0xf   :  { %s159_s25 = sshll.u32 %s289_s2, 4  ;;  %s160_s25 = int_to_ptr.vmem [resolvable:$true] %s159_s25 }
  0x11   :  { %96 = vmatpush.bf16.msra.mxu0 %v195_v1  ;;  %198 = vmatpush.bf16.msra.mxu1 %v195_v1 }
  0x14   :  { %191 = vmatmul.msk.bf16.vlgmr.msra.gmra.mxu0 %vm82_vm0, %v193_v2  ;;  %192 = vmatmul.msk.bf16.vlgmr.msra.gmra.mxu1 %vm82_vm0, %v194_v3 }
  0x91   :  { %v98_v5 = vpop.f32.mrf.mxu0  ;;  %v103_v6 = vpop.f32.mrf.mxu1 }
  0x92   :  { %v99_v7 = vadd.f32 %v205_v4, %v98_v5  ;;  %v104_v8 = vadd.f32 %v205_v4, %v103_v6 }
  0x94   :  { %v108_v9 = vpack.c.bf16 %v99_v7, %v99_v7  ;;  %v110_v10 = vpack.c.bf16 %v104_v8, %v104_v8 }
  0x96   :  { %113 = vst.msk [vmem:[#allocation7] sm:$0xf] %vm112_vm1, %v108_v9  ;;  %125 = vrot.lane.b32.xlu1 %v110_v10, %s288_s24  ;;  %138 = vrot.lane.b32.xlu2 %v108_v9, %s285_s20 }
  0x97   :  { %115 = vst.msk [vmem:[#allocation7 + $0x8] sm:$0xf] %vm112_vm1, %v110_v10  ;;  %121 = vrot.lane.b32.xlu0 %v108_v9, %s288_s24 }
  0x99   :  { %v100_v11 = vpop.f32.mrf.mxu0  ;;  %v105_v12 = vpop.f32.mrf.mxu1 }
  0x9a   :  { %v101_v13 = vadd.f32 %v205_v4, %v100_v11  ;;  %v106_v14 = vadd.f32 %v205_v4, %v105_v12 }
  0x9c   :  { %v109_v15 = vpack.c.bf16 %v101_v13, %v101_v13  ;;  %v111_v16 = vpack.c.bf16 %v106_v14, %v106_v14 }
  0x9e   :  { %114 = vst.msk [vmem:[#allocation7 + $0x4] sm:$0xf] %vm112_vm1, %v109_v15  ;;  %127 = vrot.lane.b32.xlu1 %v111_v16, %s288_s24  ;;  %140 = vrot.lane.b32.xlu2 %v109_v15, %s285_s20 }
  0x9f   :  { %116 = vst.msk [vmem:[#allocation7 + $0xc] sm:$0xf] %vm112_vm1, %v111_v16  ;;  %123 = vrot.lane.b32.xlu0 %v109_v15, %s288_s24 }
  0xa6   :  { %144 = vrot.lane.b32.xlu1 %v111_v16, %s285_s20 }
  0xa7   :  { %142 = vrot.lane.b32.xlu0 %v110_v10, %s285_s20 }
  0xf0   :  { %v139_v17 = vpop.permute.xlu2 %138 }
  0xf1   :  { %151 = vst.msk [vmem:[#allocation7 + $0x20] sm:$0xf] %vm112_vm1, %v139_v17 }
  0xf8   :  { %v141_v18 = vpop.permute.xlu2 %140 }
  0xf9   :  { %152 = vst.msk [vmem:[#allocation7 + $0x24] sm:$0xf] %vm112_vm1, %v141_v18 }
 0x108   :  { %v126_v19 = vpop.permute.xlu1 %125 }
 0x109   :  { %136 = vst.msk [vmem:[#allocation7 + $0x18] sm:$0xf] %vm112_vm1, %v126_v19  ;;  %v122_v20 = vpop.permute.xlu0 %121 }
 0x10a   :  { %134 = vst.msk [vmem:[#allocation7 + $0x10] sm:$0xf] %vm112_vm1, %v122_v20 }
 0x110   :  { %v128_v21 = vpop.permute.xlu1 %127 }
 0x111   :  { %137 = vst.msk [vmem:[#allocation7 + $0x1c] sm:$0xf] %vm112_vm1, %v128_v21  ;;  %v124_v22 = vpop.permute.xlu0 %123 }
 0x112   :  { %135 = vst.msk [vmem:[#allocation7 + $0x14] sm:$0xf] %vm112_vm1, %v124_v22 }
 0x118   :  { %v145_v23 = vpop.permute.xlu1 %144 }
 0x119   :  { %154 = vst.msk [vmem:[#allocation7 + $0x2c] sm:$0xf] %vm112_vm1, %v145_v23  ;;  %v143_v24 = vpop.permute.xlu0 %142 }
 0x11a   :  { %153 = vst.msk [vmem:[#allocation7 + $0x28] sm:$0xf] %vm112_vm1, %v143_v24 }
 0x11b   :  { %167 = dma.vmem_to_hbm [thread:$0]  %s160_s25, 768, %s162_s28, [#allocation4], %s285_s20, %s285_s20, %s286_s21  }
 0x11c   :  { %282 = dma.done.wait [#allocation4], 768  }
 0x11d   :  { %283 = vsyncadd [#allocation4], 4294966528 }
 0x11e   :  { %172 = vsyncpa [#allocation3], 1 }
 0x11f   :  { %173 = vsyncpa [#allocation6], 1 }
 0x120   :  { %174 = vsyncpa [#allocation4], 1 }

</bundles_post_ra>
